<compile_context>
chip_gen: v5e
topology: v5e:2x2
jax: 0.10.0
libtpu: 0.0.40
codegen_flags: <defaults>
</compile_context>

<pallas_src>
import jax
import jax.numpy as jnp
from jax.experimental import pallas as pl
from jax.experimental.pallas import tpu as pltpu


def _proj_kernel(a_ref, b_ref, y_ref, o_ref):
    # a_ref: (TK, N), b_ref: (TK, 1), y_ref: (1, N), o_ref: (TK, N)
    a = a_ref[...].astype(jnp.float32)
    b = b_ref[...].astype(jnp.float32)

    # Hoist the y broadcast once (broadcast_in_dim is not CSE'd by JAX); reuse it
    # for both the dot-product reduction and the final update.
    yb = jnp.broadcast_to(y_ref[...].astype(jnp.float32), a.shape)   # (TK, N)

    n2 = jnp.sum(a * a, axis=-1, keepdims=True)                      # (TK, 1)  == ||a||^2
    num = jnp.sum(a * yb, axis=-1, keepdims=True) + b                # (TK, 1)  == a.y + b
    # Exact divide on the narrow (TK, 1) column: cheap (N x less work than a
    # (TK, N) divide) and keeps full f32 accuracy (no approx-reciprocal error).
    s = num / n2                                                     # (TK, 1)

    o_ref[...] = (yb - s * a).astype(o_ref.dtype)


def _pick_tk(K, N, itemsize, target_bytes=2 << 20):
    """Largest K-tile that (a) divides K, (b) is a multiple of the sublane
    packing quantum (8 for f32, 16 for bf16), and (c) keeps one (TK, N) block
    around `target_bytes` so the double-buffered pipeline fits comfortably in
    scoped VMEM on all generations (incl. v7x's 64 MiB). Falls back to K."""
    sub = 16 if itemsize == 2 else 8
    if K % sub != 0 or K * N * itemsize <= target_bytes:
        return K
    max_rows = max(sub, target_bytes // max(1, N * itemsize))
    tk = sub
    for d in range(sub, K + 1, sub):
        if K % d == 0 and d <= max_rows:
            tk = d
    return tk


def proj_sampler(a, b, c, y, *, tk=None):
    """JAX/Pallas equivalent of ProjSampler.forward.

    a: tuple (a_l, a_k) with a_l of shape (B, K, N)
    b: tuple (b_l, b_k) with b_l of shape (B, K)
    c: unused
    y: (B, N)
    returns proj of shape (B, K, N)
    """
    a_l, _ = a
    b_l, _ = b
    del c

    B, K, N = a_l.shape
    dtype = a_l.dtype
    itemsize = jnp.dtype(dtype).itemsize
    if tk is None:
        tk = _pick_tk(K, N, itemsize)
    assert K % tk == 0, "K tile must divide K"
    kt = K // tk

    b3 = b_l.reshape(B, K, 1).astype(dtype)
    y3 = y.reshape(B, 1, N).astype(dtype)

    # Grid = (batch, K-tiles): two independent ("parallel") axes so megacore /
    # v7x dual-TensorCore sharding has work even when B is small. The output
    # block's last dim is N, which is lane-dense when N is a multiple of 128.
    # TODO(synk): for N < 128 a wrapper-side repack to a >=128-wide slab would
    # avoid masked vst.msk partial stores.
    grid_spec = pltpu.PrefetchScalarGridSpec(
        num_scalar_prefetch=0,
        grid=(B, kt),
        in_specs=[
            pl.BlockSpec((pl.Squeezed(), tk, N), lambda i, j: (i, j, 0)),
            pl.BlockSpec((pl.Squeezed(), tk, 1), lambda i, j: (i, j, 0)),
            pl.BlockSpec((pl.Squeezed(), 1, N), lambda i, j: (i, 0, 0)),
        ],
        out_specs=pl.BlockSpec((pl.Squeezed(), tk, N), lambda i, j: (i, j, 0)),
    )

    return pl.pallas_call(
        _proj_kernel,
        out_shape=jax.ShapeDtypeStruct((B, K, N), dtype),
        grid_spec=grid_spec,
        compiler_params=pltpu.CompilerParams(
            dimension_semantics=("parallel", "parallel"),
        ),
    )(a_l, b3, y3)


def _proj_sampler_ref(a, b, c, y):
    """Pure-JAX reference mirroring the PyTorch code line by line."""
    a_l, _ = a
    b_l, _ = b
    norm = jnp.linalg.norm(a_l, axis=-1)                      # (B, K)
    a_n = a_l / norm[:, :, None]                              # (B, K, N)
    b_n = b_l / norm                                          # (B, K)
    a_t = jnp.swapaxes(a_n, -1, -2)                           # (B, N, K)
    b_t = b_n[:, None, :]                                     # (B, 1, K)
    dist = jnp.matmul(y[:, None, :], a_t) + b_t               # (B, 1, K)
    proj = jnp.swapaxes(y[:, :, None] - dist * a_t, -1, -2)   # (B, K, N)
    return proj


if __name__ == "__main__":
    key = jax.random.PRNGKey(0)

    def _run(B, K, N, tk=None):
        ks = jax.random.split(jax.random.fold_in(key, B * 1000 + K * 10 + N), 5)
        a_l = jax.random.normal(ks[0], (B, K, N), dtype=jnp.float32)
        a_k = jax.random.normal(ks[1], (B, K, N), dtype=jnp.float32)  # unused (like PyTorch)
        b_l = jax.random.normal(ks[2], (B, K), dtype=jnp.float32)
        b_k = jax.random.normal(ks[3], (B, K), dtype=jnp.float32)     # unused (like PyTorch)
        y = jax.random.normal(ks[4], (B, N), dtype=jnp.float32)

        out = jax.block_until_ready(
            proj_sampler((a_l, a_k), (b_l, b_k), None, y, tk=tk)
        )
        ref = _proj_sampler_ref((a_l, a_k), (b_l, b_k), None, y)
        assert out.shape == (B, K, N)
        assert jnp.allclose(out, ref, atol=1e-5, rtol=1e-5), (
            f"mismatch vs reference at B={B}, K={K}, N={N}"
        )

    # Small shapes consistent with the module: batch=2, constraints=8, vars=128
    # (lane-dense output path).
    _run(B=2, K=8, N=128)
    # Exercise the K-tiled path explicitly: grid=(B, K//TK) with TK=16.
    _run(B=2, K=32, N=128, tk=16)

    print("KERNEL_OK")
</pallas_src>

<mosaic_0001>
module attributes {stable_mosaic.version = 11 : i64} {
  func.func @_proj_kernel(%arg0: i32, %arg1: i32, %arg2: memref<1x8x128xf32, #tpu.memory_space<vmem>>, %arg3: memref<1x8x1xf32, #tpu.memory_space<vmem>>, %arg4: memref<1x1x128xf32, #tpu.memory_space<vmem>>, %arg5: memref<1x8x128xf32, #tpu.memory_space<vmem>>) attributes {dimension_semantics = [#tpu.dimension_semantics<parallel>, #tpu.dimension_semantics<parallel>], iteration_bounds = array<i64: 2, 1>, scalar_prefetch = 0 : i64, scratch_operands = 0 : i64, tpu.core_type = #tpu.core_type<tc>, window_params = [{transform_indices = @transform_0, window_bounds = array<i64: 1, 8, 128>}, {transform_indices = @transform_1, window_bounds = array<i64: 1, 8, 1>}, {transform_indices = @transform_2, window_bounds = array<i64: 1, 1, 128>}, {transform_indices = @transform_3, window_bounds = array<i64: 1, 8, 128>}]} {
    %c0 = arith.constant 0 : index
    %c0_0 = arith.constant 0 : index
    %c0_1 = arith.constant 0 : index
    %0 = vector.load %arg2[%c0, %c0_0, %c0_1] : memref<1x8x128xf32, #tpu.memory_space<vmem>>, vector<1x8x128xf32>
    %1 = vector.shape_cast %0 : vector<1x8x128xf32> to vector<8x128xf32>
    %c0_2 = arith.constant 0 : index
    %c0_3 = arith.constant 0 : index
    %c0_4 = arith.constant 0 : index
    %2 = vector.load %arg3[%c0_2, %c0_3, %c0_4] : memref<1x8x1xf32, #tpu.memory_space<vmem>>, vector<1x8x1xf32>
    %3 = vector.shape_cast %2 : vector<1x8x1xf32> to vector<8x1xf32>
    %c0_5 = arith.constant 0 : index
    %c0_6 = arith.constant 0 : index
    %c0_7 = arith.constant 0 : index
    %4 = vector.load %arg4[%c0_5, %c0_6, %c0_7] : memref<1x1x128xf32, #tpu.memory_space<vmem>>, vector<1x1x128xf32>
    %5 = vector.shape_cast %4 : vector<1x1x128xf32> to vector<1x128xf32>
    %6 = vector.shape_cast %5 : vector<1x128xf32> to vector<1x128xf32>
    %7 = vector.broadcast %6 : vector<1x128xf32> to vector<8x128xf32>
    %8 = arith.mulf %1, %1 : vector<8x128xf32>
    %cst = arith.constant dense<0.000000e+00> : vector<8xf32>
    %9 = vector.multi_reduction <add>, %8, %cst [1] : vector<8x128xf32> to vector<8xf32>
    %10 = vector.shape_cast %9 : vector<8xf32> to vector<8x1xf32>
    %11 = arith.mulf %1, %7 : vector<8x128xf32>
    %cst_8 = arith.constant dense<0.000000e+00> : vector<8xf32>
    %12 = vector.multi_reduction <add>, %11, %cst_8 [1] : vector<8x128xf32> to vector<8xf32>
    %13 = vector.shape_cast %12 : vector<8xf32> to vector<8x1xf32>
    %14 = arith.addf %13, %3 : vector<8x1xf32>
    %15 = arith.divf %14, %10 : vector<8x1xf32>
    %16 = vector.broadcast %15 : vector<8x1xf32> to vector<8x128xf32>
    %17 = arith.mulf %16, %1 : vector<8x128xf32>
    %18 = arith.subf %7, %17 : vector<8x128xf32>
    %c0_9 = arith.constant 0 : index
    %c0_10 = arith.constant 0 : index
    %c0_11 = arith.constant 0 : index
    %19 = vector.load %arg5[%c0_9, %c0_10, %c0_11] : memref<1x8x128xf32, #tpu.memory_space<vmem>>, vector<1x8x128xf32>
    %20 = vector.shape_cast %19 : vector<1x8x128xf32> to vector<8x128xf32>
    %21 = vector.shape_cast %18 : vector<8x128xf32> to vector<1x8x128xf32>
    tpu.vector_store %arg5[%c0_9, %c0_10, %c0_11], %21 {strides = array<i32>} : memref<1x8x128xf32, #tpu.memory_space<vmem>>, vector<1x8x128xf32>,
    return
  }
  func.func @transform_0(%arg0: i32, %arg1: i32) -> (i32, i32, i32) {
    %c0_i32 = arith.constant 0 : i32
    %c0_i32_0 = arith.constant 0 : i32
    return %arg0, %arg1, %c0_i32 : i32, i32, i32
  }
  func.func @transform_1(%arg0: i32, %arg1: i32) -> (i32, i32, i32) {
    %c0_i32 = arith.constant 0 : i32
    %c0_i32_0 = arith.constant 0 : i32
    return %arg0, %arg1, %c0_i32 : i32, i32, i32
  }
  func.func @transform_2(%arg0: i32, %arg1: i32) -> (i32, i32, i32) {
    %c0_i32 = arith.constant 0 : i32
    %c0_i32_0 = arith.constant 0 : i32
    %c0_i32_1 = arith.constant 0 : i32
    return %arg0, %c0_i32, %c0_i32_0 : i32, i32, i32
  }
  func.func @transform_3(%arg0: i32, %arg1: i32) -> (i32, i32, i32) {
    %c0_i32 = arith.constant 0 : i32
    %c0_i32_0 = arith.constant 0 : i32
    return %arg0, %arg1, %c0_i32 : i32, i32, i32
  }
}

</mosaic_0001>

<bundles_post_ra>
// kernel: tpu_custom_call.1
= control target key start
LH: loop header
LB: loop body
LE: loop exit
PB: predicated region body
PF: predicated region fallthrough
CT: control target
= control target key end

     0   :  { %8 = vsyncpa [#allocation3], 0  ;;  %s658_s0 = inlined_call_operand.vmem [shape: f32[2,8,128], index: 0, kind: input, shape index: {}]   ;;  %s659_s1 = inlined_call_operand.vmem [shape: f32[2,8,1], index: 1, kind: input, shape index: {}]   ;;  %s660_s2 = inlined_call_operand.vmem [shape: f32[2,1,128], index: 2, kind: input, shape index: {}]   ;;  %s661_s3 = inlined_call_operand.hbm [shape: f32[2,8,128], index: 3, kind: output, shape index: {}]  }
   0x1   :  { %10 = vsyncpa [#allocation3 + $0x1], 0  ;;  %s555_s12 = smov 0   ;;  %s557_s13 = smov 0  }
   0x2   :  { %s559_s14 = smov 0   ;;  %s561_s15 = smov 0  }
   0x3   :  { %s563_s16 = smov 0   ;;  %s565_s17 = smov 0  }
   0x4 LB: > { %s381_s18 = sadd.s32 4294967295, %s532_s17   ;;  %s382_s19 = sadd.s32 4294967294, %s532_s17   ;;  %s532_s17 = sphi %s565_s17, %s16_s17   ;;  %s528_s16 = sphi %s563_s16, %s668_s16   ;;  %s524_s15 = sphi %s561_s15, %s667_s15   ;;  %s520_s14 = sphi %s559_s14, %s666_s14   ;;  %s516_s13 = sphi %s557_s13, %s665_s13   ;;  %s512_s12 = sphi %s555_s12, %s664_s12  }
   0x5   : > { %s28_s20 = sadd.s32 1, %s528_s16  ;;  %s119_s21 = sadd.s32 1, %s520_s14 }
   0x6   : > { %p30_p0 = scmp.ge.s32.totalorder %s28_s20, 2  ;;  %p129_p1 = scmp.ne.s32.totalorder %s520_s14, %s516_s13 }
   0x7   : > { %p130_p2 = scmp.eq.s32.totalorder %s381_s18, 1  ;;  %p135_p3 = scmp.ne.s32.totalorder %s516_s13, %s512_s12 }
   0x8   : > { %s670_s20 = smov (%p30_p0, %s28_s20), 0  ;;  %p136_p5 = scmp.eq.s32.totalorder %s382_s19, 1 }
   0x9   : > { %p595_p4 = por %p130_p2, %p129_p1  ;;  %s114_s23 = ssub.s32 %s528_s16, %s670_s20 }
   0xa   : > { %p385_p6 = scmp.ge.s32.totalorder %s532_s17, 1  ;;  %p117_p7 = scmp.eq.s32.totalorder %s114_s23, 0 }
   0xb   : > { %p602_p8 = por %p136_p5, %p135_p3  ;;  %p180_p9 = scmp.lt.s32.totalorder %s532_s17, 3 }
   0xc   : > { %s608_s25 = scalar_select %p117_p7, %s520_s14, %s119_s21  }
   0xd   : > { %p181_p10 = pnand %p385_p6, %p180_p9 }
   0xe   : > { %p216_p11 = scmp.lt.s32.totalorder (!%p181_p10), %s524_s15, 1  ;;  %s213_s10 = sand.u32 (!%p181_p10), 1, %s516_s13  }
   0xf   : > { %184 = sbr.rel (%p181_p10) target bundleno = 284 (0x11c), region = 32  ;;  %s386_s11 = sshll.u32 (!%p181_p10), %s213_s10, 3 }
  0x10   : > { %s390_s18 = sshll.u32 (!%p181_p10), %s524_s15, 3  ;;  %s270_s29 = scalar_lea.sflag (!%p181_p10), [#allocation3], %s213_s10 }
  0x11   : > { %s281_s23 = scalar_lea.hbm (!%p181_p10), %s661_s3, %s390_s18 }
  0x12   : > { %s285_s28 = sshll.u32 (!%p181_p10), %s281_s23, 4  ;;  %s286_s28 = int_to_ptr.hbm [resolvable:$true] %s285_s28 }
  0x14   : > { %s217_s26 = scalar_select %p216_p11, %s524_s15, 1  ;;  %v534_v4 = vmov 0  }
  0x15   : > { %449 = vset.pattern.permute.xlu1 %v534_v4  ;;  %450 = vset.pattern.permute.xlu0 %v534_v4 }
  0x16   : > { %s387_s27 = sshll.u32 %s217_s26, 3  ;;  %s232_s30 = scalar_lea.vmem %s660_s2, %s217_s26 }
  0x17   : > { %s222_s6 = scalar_lea.vmem %s658_s0, %s387_s27  ;;  %v451_v2 = vld [vmem:[%s232_s30] ss:$0 sm:$0xff]  ;;  %s229_s9 = scalar_lea.vmem %s659_s1, %s387_s27 }
  0x18   : > { %v233_v0 = vld [vmem:[%s222_s6] sm:$0xff]  ;;  %s215_s26 = scalar_lea.vmem [#allocation2], %s386_s11  ;;  %s468_s30 = sshra.s32 %s286_s28, 4  ;;  %s469_s30 = int_to_ptr.hbm [resolvable:$true] %s468_s30 }
  0x19   : > { %v239_v1 = vmul.f32 %v233_v0, %v233_v0  ;;  %v242_v3 = vmul.f32 %v451_v2, %v233_v0  ;;  %v234_v9 = vld [vmem:[%s229_s9] sm:$0xff]  ;;  %s283_s27 = sshll.u32 %s215_s26, 4  ;;  %s470_s4 = scalar_lea.hbm %s469_s30, 8  ;;  %s284_s27 = int_to_ptr.vmem [resolvable:$true] %s283_s27 }
  0x1a   : > { %p471_p12 = scmp.ne.s32.totalorder %s469_s30, %s470_s4  ;;  %s474_s6 = scalar_lea.hbm %s661_s3, 16 }
  0x1b   : > { %240 = vadd.xlane.f32.xlu0 %v239_v1  ;;  %p475_p1 = scmp.lt.s32.totalorder %s469_s30, %s661_s3  ;;  %p476_p2 = scmp.lt.s32.totalorder %s474_s6, %s470_s4 }
  0x1c   : > { %p472_p13 = pnand %p471_p12, %p595_p4 }
  0x1d   : > { %p477_p3 = por %p476_p2, %p475_p1 }
  0x1e   : > { %p473_p0 = pneg %p472_p13 }
  0x20   : > { %p478_p5 = pnand %p477_p3, %p473_p0 }
  0x23   : > { %243 = vadd.xlane.f32.xlu0 %v242_v3 }
  0x8e   : > { %v241_v5 = vpop.xlane.xlu0 %240 }
  0x8f   : > { %452 = vrcp.f32 %v241_v5  ;;  %v257_v11 = vand.u32 2147483648, %v241_v5  ;;  %v255_v13 = vand.u32 2147483647, %v241_v5  ;;  %vm251_vm1 = vweird.f32 %v241_v5 }
  0x91   : > { %v258_v16 = vor.u32 1.1754944e-38, %v257_v11  ;;  %vm256_vm3 = vcmp.eq.f32.partialorder %v255_v13, 8.507059e+37 }
  0x95   : > { %v453_v6 = vpop.eup %452 }
  0x96   : > { %v247_v7 = vmul.f32 %v453_v6, %v241_v5  ;;  %v244_v10 = vpop.xlane.xlu0 %243  ;;  %vm252_vm0 = vweird.f32 %v453_v6 }
  0x97   : > { %v245_v14 = vadd.f32 %v244_v10, %v234_v9  ;;  %vm253_vm2 = vmor %vm251_vm1, %vm252_vm0 }
  0x98   : > { %v248_v8 = vsub.f32 1.0, %v247_v7 }
  0x9a   : > { %v249_v12 = vmul.f32 %v453_v6, %v248_v8 }
  0x9c   : > { %v250_v15 = vadd.f32 %v453_v6, %v249_v12 }
  0x9e   : > { %v254_v17 = vsel %vm253_vm2, %v453_v6, %v250_v15 }
  0x9f   : > { %v259_v18 = vsel %vm256_vm3, %v258_v16, %v254_v17 }
  0xa0   : > { %v260_v19 = vmul.f32 %v259_v18, %v245_v14 }
  0xa2   : > { %263 = vperm.xlu1 %449, %v260_v19  }
 0x114   : > { %v264_v20 = vpop.permute.xlu1 %263 }
 0x115   : > { %v266_v21 = vmul.f32 %v264_v20, %v233_v0 }
 0x117   : > { %v267_v22 = vsub.f32 %v451_v2, %v266_v21 }
 0x119   : > { %268 = vst [vmem:[%s215_s26] sm:$0xff] %v267_v22 }
 0x11a   : > { %481 = shalt.err (!%p478_p5)
}
 0x11b   : > { %393 = dma.vmem_to_hbm [thread:$0]  (%p595_p4), %s284_s27, 128, %s286_s28, %s270_s29  }
 0x11c PF: > { %p399_p6 = scmp.ge.s32.totalorder %s532_s17, 2  ;;  %s297_s9 = sand.u32 1, %s512_s12  }
 0x11d   : > { %s298_s10 = scalar_lea.sflag [#allocation3], %s297_s9 }
 0x11e   : > { %p396_p7 = pnand %p399_p6, %p602_p8 }
 0x120   : > { %p397_p9 = pneg %p396_p7 }
 0x122   : > { %507 = dma.done.wait (%p397_p9), %s298_s10, 128  }
 0x123   : > { %509 = vsyncadd (%p397_p9), %s298_s10, 4294967168  ;;  %s16_s17 = sadd.s32 1, %s532_s17   ;;  %s664_s12 = smov %s516_s13 }
 0x124   : > { %p13_p10 = scmp.ge.s32.totalorder %s16_s17, 4   ;;  %s665_s13 = smov %s520_s14 }
 0x125   : > { %s666_s14 = smov %s608_s25  ;;  %s667_s15 = smov %s528_s16 }
 0x126   : > { %s668_s16 = smov %s670_s20  ;;  %15 = sbr.rel (!%p13_p10) target bundleno = 4 (0x4), region = 73 }
 0x12b   :  { %304 = vsyncpa [#allocation3], 1 }
 0x12c   :  { %306 = vsyncpa [#allocation3 + $0x1], 1 }

</bundles_post_ra>
